<compile_context>
chip_gen: v5e
topology: v5e:2x2
jax: 0.10.0
libtpu: 0.0.40
codegen_flags: <defaults>
</compile_context>

<pallas_src>
import functools
import math

import jax
import jax.numpy as jnp
from jax.experimental import pallas as pl
from jax.experimental.pallas import tpu as pltpu

_BN_EPS = 1e-5


# ----------------------------------------------------------------------------
# Pallas kernels
# ----------------------------------------------------------------------------
def _pool_atten_kernel(x_ref, w_ref, s_ref, b_ref, o_ref, acc_ref, *, inv_p):
    """Global-avg-pool + 1x1 conv + folded BN + sigmoid for one image.

    x_ref: (1, C, tile_P)   w_ref: (C, C)   s_ref/b_ref: (C, 1)
    o_ref: (1, C, 1)        acc_ref: (C, 1) f32 scratch (resident over P tiles)
    """
    j = pl.program_id(1)

    @pl.when(j == 0)
    def _():
        acc_ref[...] = jnp.zeros_like(acc_ref)

    # accumulate spatial sum (lane reduce -> XLU)
    acc_ref[...] += jnp.sum(x_ref[0], axis=-1, keepdims=True)

    @pl.when(j == pl.num_programs(1) - 1)
    def _():
        pooled = acc_ref[...] * inv_p                                  # (C, 1)
        y = jnp.dot(w_ref[...], pooled,
                    preferred_element_type=jnp.float32)                # (C, 1)
        y = y * s_ref[...] + b_ref[...]                                # BN folded
        o_ref[0] = (1.0 / (1.0 + jnp.exp(-y))).astype(o_ref.dtype)     # sigmoid


def _apply_atten_kernel(x_ref, a_ref, o_ref):
    """out = atten * x + x  ==  x * (atten + 1).

    x_ref: (1, C, tile_P)   a_ref: (1, C, 1)   o_ref: (1, C, tile_P)
    """
    o_ref[0] = x_ref[0] * (a_ref[0] + 1.0)


# ----------------------------------------------------------------------------
# Pallas wrappers
# ----------------------------------------------------------------------------
def _choose_tile_p(p_total, c, bytes_per_elem=4, max_block_bytes=2 * 1024 * 1024):
    """Largest multiple-of-128 divisor of p_total whose (C, tile_P) block fits
    the per-block byte budget; falls back to the whole image if P % 128 != 0."""
    if p_total % 128 != 0:
        return p_total
    budget = max(max_block_bytes // (c * bytes_per_elem), 128)
    tile = min(p_total, (budget // 128) * 128)
    tile = max(tile, 128)
    while p_total % tile:
        tile -= 128
    return tile


def pallas_pool_atten(x3, w, scale, bias):
    """x3: (N, C, P) f32; w: (C, C); scale/bias: (C,). Returns atten (N, C, 1)."""
    n, c, p_total = x3.shape
    tile_p = _choose_tile_p(p_total, c)
    n_p = p_total // tile_p
    kern = functools.partial(_pool_atten_kernel, inv_p=1.0 / p_total)
    return pl.pallas_call(
        kern,
        out_shape=jax.ShapeDtypeStruct((n, c, 1), jnp.float32),
        grid_spec=pltpu.PrefetchScalarGridSpec(
            num_scalar_prefetch=0,
            grid=(n, n_p),
            in_specs=[
                pl.BlockSpec((1, c, tile_p), lambda i, j: (i, 0, j)),
                pl.BlockSpec((c, c), lambda i, j: (0, 0)),
                pl.BlockSpec((c, 1), lambda i, j: (0, 0)),
                pl.BlockSpec((c, 1), lambda i, j: (0, 0)),
            ],
            out_specs=pl.BlockSpec((1, c, 1), lambda i, j: (i, 0, 0)),
            scratch_shapes=[pltpu.VMEM((c, 1), jnp.float32)],
        ),
        compiler_params=pltpu.CompilerParams(
            dimension_semantics=("parallel", "arbitrary")),
    )(x3, w, scale.reshape(c, 1), bias.reshape(c, 1))


def pallas_apply_atten(x3, atten):
    """x3: (N, C, P); atten: (N, C, 1). Returns x3 * (atten + 1)."""
    n, c, p_total = x3.shape
    tile_p = _choose_tile_p(p_total, c)
    n_p = p_total // tile_p
    return pl.pallas_call(
        _apply_atten_kernel,
        out_shape=jax.ShapeDtypeStruct((n, c, p_total), x3.dtype),
        grid_spec=pltpu.PrefetchScalarGridSpec(
            num_scalar_prefetch=0,
            grid=(n, n_p),
            in_specs=[
                pl.BlockSpec((1, c, tile_p), lambda i, j: (i, 0, j)),
                pl.BlockSpec((1, c, 1), lambda i, j: (i, 0, 0)),
            ],
            out_specs=pl.BlockSpec((1, c, tile_p), lambda i, j: (i, 0, j)),
        ),
        compiler_params=pltpu.CompilerParams(
            dimension_semantics=("parallel", "parallel")),
    )(x3, atten)


# ----------------------------------------------------------------------------
# Forward pass (mirrors channel_atten.forward; NCHW in / NCHW out)
# ----------------------------------------------------------------------------
def channel_atten_forward(params, x_nchw):
    x = x_nchw.astype(jnp.float32)
    n, c, h, w = x.shape
    x3 = x.reshape(n, c, h * w)                      # spatial -> lanes (no transpose)

    # fold BatchNorm (eval mode) into the 1x1-conv epilogue
    scale = params["gamma"] / jnp.sqrt(params["var"] + _BN_EPS)
    bias = (params["b"] - params["mean"]) * scale + params["beta"]

    atten = pallas_pool_atten(x3, params["w"], scale, bias)   # (N, C, 1)
    out3 = pallas_apply_atten(x3, atten)                      # (N, C, H*W)
    return out3.reshape(n, c, h, w)


# pure-JAX reference (eval-mode BN) for a correctness check
def channel_atten_ref(params, x):
    n, c, h, w = x.shape
    pooled = jnp.mean(x, axis=(2, 3))                         # (N, C)
    y = pooled @ params["w"].T + params["b"]
    y = (y - params["mean"]) / jnp.sqrt(params["var"] + _BN_EPS) * params["gamma"] \
        + params["beta"]
    atten = jax.nn.sigmoid(y).reshape(n, c, 1, 1)
    return atten * x + x


# ----------------------------------------------------------------------------
# Parameter init (deterministic, PyTorch-default-style uniform)
# ----------------------------------------------------------------------------
def init_params(key, channels):
    kw, kb = jax.random.split(key)
    bound = 1.0 / math.sqrt(channels)               # fan_in = channels * 1 * 1
    w = jax.random.uniform(kw, (channels, channels), jnp.float32, -bound, bound)
    b = jax.random.uniform(kb, (channels,), jnp.float32, -bound, bound)
    return {
        "w": w, "b": b,
        "gamma": jnp.ones((channels,), jnp.float32),
        "beta": jnp.zeros((channels,), jnp.float32),
        "mean": jnp.zeros((channels,), jnp.float32),
        "var": jnp.ones((channels,), jnp.float32),
    }


# ----------------------------------------------------------------------------
if __name__ == "__main__":
    key = jax.random.PRNGKey(0)
    k_param, k_x = jax.random.split(key)

    channels = 64
    params = init_params(k_param, channels)
    x = jax.random.normal(k_x, (2, channels, 16, 16), jnp.float32)  # NCHW

    fwd = jax.jit(channel_atten_forward)
    y = fwd(params, x)
    jax.block_until_ready(y)

    y_ref = channel_atten_ref(params, x)
    assert y.shape == x.shape, y.shape
    assert bool(jnp.all(jnp.isfinite(y)))
    assert bool(jnp.allclose(y, y_ref, rtol=1e-4, atol=1e-4)), \
        float(jnp.max(jnp.abs(y - y_ref)))
    print("KERNEL_OK")
</pallas_src>

<mosaic_0001>
module attributes {stable_mosaic.version = 11 : i64} {
  func.func @_apply_atten_kernel(%arg0: i32, %arg1: i32, %arg2: memref<1x64x256xf32, #tpu.memory_space<vmem>>, %arg3: memref<1x64x1xf32, #tpu.memory_space<vmem>>, %arg4: memref<1x64x256xf32, #tpu.memory_space<vmem>>) attributes {dimension_semantics = [#tpu.dimension_semantics<parallel>, #tpu.dimension_semantics<parallel>], iteration_bounds = array<i64: 2, 1>, scalar_prefetch = 0 : i64, scratch_operands = 0 : i64, tpu.core_type = #tpu.core_type<tc>, window_params = [{transform_indices = @transform_0, window_bounds = array<i64: 1, 64, 256>}, {transform_indices = @transform_1, window_bounds = array<i64: 1, 64, 1>}, {transform_indices = @transform_2, window_bounds = array<i64: 1, 64, 256>}]} {
    %c0 = arith.constant 0 : index
    %c0_0 = arith.constant 0 : index
    %c0_1 = arith.constant 0 : index
    %0 = vector.load %arg2[%c0, %c0_0, %c0_1] : memref<1x64x256xf32, #tpu.memory_space<vmem>>, vector<1x64x256xf32>
    %1 = vector.shape_cast %0 : vector<1x64x256xf32> to vector<64x256xf32>
    %c0_2 = arith.constant 0 : index
    %c0_3 = arith.constant 0 : index
    %c0_4 = arith.constant 0 : index
    %2 = vector.load %arg3[%c0_2, %c0_3, %c0_4] : memref<1x64x1xf32, #tpu.memory_space<vmem>>, vector<1x64x1xf32>
    %3 = vector.shape_cast %2 : vector<1x64x1xf32> to vector<64x1xf32>
    %cst = arith.constant 1.000000e+00 : f32
    %4 = vector.broadcast %cst : f32 to vector<64x1xf32>
    %5 = arith.addf %3, %4 : vector<64x1xf32>
    %6 = vector.broadcast %5 : vector<64x1xf32> to vector<64x256xf32>
    %7 = arith.mulf %1, %6 : vector<64x256xf32>
    %c0_5 = arith.constant 0 : index
    %c0_6 = arith.constant 0 : index
    %c0_7 = arith.constant 0 : index
    %8 = vector.load %arg4[%c0_5, %c0_6, %c0_7] : memref<1x64x256xf32, #tpu.memory_space<vmem>>, vector<1x64x256xf32>
    %9 = vector.shape_cast %8 : vector<1x64x256xf32> to vector<64x256xf32>
    %10 = vector.shape_cast %7 : vector<64x256xf32> to vector<1x64x256xf32>
    tpu.vector_store %arg4[%c0_5, %c0_6, %c0_7], %10 {strides = array<i32>} : memref<1x64x256xf32, #tpu.memory_space<vmem>>, vector<1x64x256xf32>,
    return
  }
  func.func @transform_0(%arg0: i32, %arg1: i32) -> (i32, i32, i32) {
    %c0_i32 = arith.constant 0 : i32
    %c0_i32_0 = arith.constant 0 : i32
    return %arg0, %c0_i32, %arg1 : i32, i32, i32
  }
  func.func @transform_1(%arg0: i32, %arg1: i32) -> (i32, i32, i32) {
    %c0_i32 = arith.constant 0 : i32
    %c0_i32_0 = arith.constant 0 : i32
    %c0_i32_1 = arith.constant 0 : i32
    return %arg0, %c0_i32, %c0_i32_0 : i32, i32, i32
  }
  func.func @transform_2(%arg0: i32, %arg1: i32) -> (i32, i32, i32) {
    %c0_i32 = arith.constant 0 : i32
    %c0_i32_0 = arith.constant 0 : i32
    return %arg0, %c0_i32, %arg1 : i32, i32, i32
  }
}

module attributes {stable_mosaic.version = 11 : i64} {
  func.func @_pool_atten_kernel(%arg0: i32, %arg1: i32, %arg2: memref<1x64x256xf32, #tpu.memory_space<vmem>>, %arg3: memref<64x64xf32, #tpu.memory_space<vmem>>, %arg4: memref<64x1xf32, #tpu.memory_space<vmem>>, %arg5: memref<64x1xf32, #tpu.memory_space<vmem>>, %arg6: memref<1x64x1xf32, #tpu.memory_space<vmem>>, %arg7: memref<64x1xf32, #tpu.memory_space<vmem>>) attributes {dimension_semantics = [#tpu.dimension_semantics<parallel>, #tpu.dimension_semantics<arbitrary>], iteration_bounds = array<i64: 2, 1>, scalar_prefetch = 0 : i64, scratch_operands = 1 : i64, tpu.core_type = #tpu.core_type<tc>, window_params = [{transform_indices = @transform_0, window_bounds = array<i64: 1, 64, 256>}, {pipeline_mode = #tpu.pipeline_mode<synchronous>, transform_indices = @transform_1, window_bounds = array<i64: 64, 64>}, {pipeline_mode = #tpu.pipeline_mode<synchronous>, transform_indices = @transform_2, window_bounds = array<i64: 64, 1>}, {pipeline_mode = #tpu.pipeline_mode<synchronous>, transform_indices = @transform_3, window_bounds = array<i64: 64, 1>}, {transform_indices = @transform_4, window_bounds = array<i64: 1, 64, 1>}]} {
    %c0_i32 = arith.constant 0 : i32
    %0 = arith.cmpi eq, %arg1, %c0_i32 : i32
    %1 = arith.extui %0 : i1 to i32
    %c0_i32_0 = arith.constant 0 : i32
    %2 = arith.cmpi ne, %1, %c0_i32_0 : i32
    scf.if %2 {
      %cst_9 = arith.constant 0.000000e+00 : f32
      %13 = vector.broadcast %cst_9 : f32 to vector<64x1xf32>
      %c0_10 = arith.constant 0 : index
      %c0_11 = arith.constant 0 : index
      %14 = vector.load %arg7[%c0_10, %c0_11] : memref<64x1xf32, #tpu.memory_space<vmem>>, vector<64x1xf32>
      tpu.vector_store %arg7[%c0_10, %c0_11], %13 {strides = array<i32>} : memref<64x1xf32, #tpu.memory_space<vmem>>, vector<64x1xf32>,
    } else {
    }
    %c0 = arith.constant 0 : index
    %c0_1 = arith.constant 0 : index
    %3 = vector.load %arg7[%c0, %c0_1] : memref<64x1xf32, #tpu.memory_space<vmem>>, vector<64x1xf32>
    %c0_2 = arith.constant 0 : index
    %c0_3 = arith.constant 0 : index
    %c0_4 = arith.constant 0 : index
    %4 = vector.load %arg2[%c0_2, %c0_3, %c0_4] : memref<1x64x256xf32, #tpu.memory_space<vmem>>, vector<1x64x256xf32>
    %5 = vector.shape_cast %4 : vector<1x64x256xf32> to vector<64x256xf32>
    %cst = arith.constant dense<0.000000e+00> : vector<64xf32>
    %6 = vector.multi_reduction <add>, %5, %cst [1] : vector<64x256xf32> to vector<64xf32>
    %7 = vector.shape_cast %6 : vector<64xf32> to vector<64x1xf32>
    %8 = arith.addf %3, %7 : vector<64x1xf32>
    %c0_5 = arith.constant 0 : index
    %c0_6 = arith.constant 0 : index
    %9 = vector.load %arg7[%c0_5, %c0_6] : memref<64x1xf32, #tpu.memory_space<vmem>>, vector<64x1xf32>
    tpu.vector_store %arg7[%c0_5, %c0_6], %8 {strides = array<i32>} : memref<64x1xf32, #tpu.memory_space<vmem>>, vector<64x1xf32>,
    %c0_i32_7 = arith.constant 0 : i32
    %10 = arith.cmpi eq, %arg1, %c0_i32_7 : i32
    %11 = arith.extui %10 : i1 to i32
    %c0_i32_8 = arith.constant 0 : i32
    %12 = arith.cmpi ne, %11, %c0_i32_8 : i32
    scf.if %12 {
      %c0_9 = arith.constant 0 : index
      %c0_10 = arith.constant 0 : index
      %13 = vector.load %arg7[%c0_9, %c0_10] : memref<64x1xf32, #tpu.memory_space<vmem>>, vector<64x1xf32>
      %cst_11 = arith.constant 3.906250e-03 : f32
      %14 = vector.broadcast %cst_11 : f32 to vector<64x1xf32>
      %15 = arith.mulf %13, %14 : vector<64x1xf32>
      %c0_12 = arith.constant 0 : index
      %c0_13 = arith.constant 0 : index
      %16 = vector.load %arg3[%c0_12, %c0_13] : memref<64x64xf32, #tpu.memory_space<vmem>>, vector<64x64xf32>
      %cst_14 = arith.constant dense<0.000000e+00> : vector<64x1xf32>
      %17 = tpu.matmul %16, %15, %cst_14 {dimension_numbers = #tpu.dot_dimension_numbers<[1], [0], [0], [1], [0, 0, 1, 1], [], []>} : vector<64x64xf32>, vector<64x1xf32>, vector<64x1xf32> -> vector<64x1xf32>
      %c0_15 = arith.constant 0 : index
      %c0_16 = arith.constant 0 : index
      %18 = vector.load %arg4[%c0_15, %c0_16] : memref<64x1xf32, #tpu.memory_space<vmem>>, vector<64x1xf32>
      %19 = arith.mulf %17, %18 : vector<64x1xf32>
      %c0_17 = arith.constant 0 : index
      %c0_18 = arith.constant 0 : index
      %20 = vector.load %arg5[%c0_17, %c0_18] : memref<64x1xf32, #tpu.memory_space<vmem>>, vector<64x1xf32>
      %21 = arith.addf %19, %20 : vector<64x1xf32>
      %cst_19 = arith.constant 0.000000e+00 : f32
      %22 = vector.broadcast %cst_19 : f32 to vector<64x1xf32>
      %23 = arith.subf %22, %21 : vector<64x1xf32>
      %24 = math.exp %23 : vector<64x1xf32>
      %cst_20 = arith.constant 1.000000e+00 : f32
      %25 = vector.broadcast %cst_20 : f32 to vector<64x1xf32>
      %26 = arith.addf %25, %24 : vector<64x1xf32>
      %cst_21 = arith.constant 1.000000e+00 : f32
      %27 = vector.broadcast %cst_21 : f32 to vector<64x1xf32>
      %28 = arith.divf %27, %26 : vector<64x1xf32>
      %c0_22 = arith.constant 0 : index
      %c0_23 = arith.constant 0 : index
      %c0_24 = arith.constant 0 : index
      %29 = vector.load %arg6[%c0_22, %c0_23, %c0_24] : memref<1x64x1xf32, #tpu.memory_space<vmem>>, vector<1x64x1xf32>
      %30 = vector.shape_cast %29 : vector<1x64x1xf32> to vector<64x1xf32>
      %31 = vector.shape_cast %28 : vector<64x1xf32> to vector<1x64x1xf32>
      tpu.vector_store %arg6[%c0_22, %c0_23, %c0_24], %31 {strides = array<i32>} : memref<1x64x1xf32, #tpu.memory_space<vmem>>, vector<1x64x1xf32>,
    } else {
    }
    return
  }
  func.func @transform_0(%arg0: i32, %arg1: i32) -> (i32, i32, i32) {
    %c0_i32 = arith.constant 0 : i32
    %c0_i32_0 = arith.constant 0 : i32
    return %arg0, %c0_i32, %arg1 : i32, i32, i32
  }
  func.func @transform_1(%arg0: i32, %arg1: i32) -> (i32, i32) {
    %c0_i32 = arith.constant 0 : i32
    %c0_i32_0 = arith.constant 0 : i32
    %c0_i32_1 = arith.constant 0 : i32
    return %c0_i32, %c0_i32_0 : i32, i32
  }
  func.func @transform_2(%arg0: i32, %arg1: i32) -> (i32, i32) {
    %c0_i32 = arith.constant 0 : i32
    %c0_i32_0 = arith.constant 0 : i32
    %c0_i32_1 = arith.constant 0 : i32
    return %c0_i32, %c0_i32_0 : i32, i32
  }
  func.func @transform_3(%arg0: i32, %arg1: i32) -> (i32, i32) {
    %c0_i32 = arith.constant 0 : i32
    %c0_i32_0 = arith.constant 0 : i32
    %c0_i32_1 = arith.constant 0 : i32
    return %c0_i32, %c0_i32_0 : i32, i32
  }
  func.func @transform_4(%arg0: i32, %arg1: i32) -> (i32, i32, i32) {
    %c0_i32 = arith.constant 0 : i32
    %c0_i32_0 = arith.constant 0 : i32
    %c0_i32_1 = arith.constant 0 : i32
    return %arg0, %c0_i32, %c0_i32_0 : i32, i32, i32
  }
}

</mosaic_0001>

<bundles_post_ra>
// kernel: channel_atten_forward.3
= control target key start
LH: loop header
LB: loop body
LE: loop exit
PB: predicated region body
PF: predicated region fallthrough
CT: control target
= control target key end

     0   :  { %s490_s9 = smov 0   ;;  %s492_s10 = smov 0   ;;  %s566_s0 = inlined_call_operand.vmem [shape: f32[2,64,256], index: 0, kind: input, shape index: {}]   ;;  %s567_s1 = inlined_call_operand.vmem [shape: f32[2,64,1], index: 1, kind: input, shape index: {}]   ;;  %s568_s2 = inlined_call_operand.vmem [shape: f32[2,64,256], index: 2, kind: output, shape index: {}]  }
   0x1   :  { %s494_s11 = smov 0  }
   0x2 LB: > { %s24_s12 = sadd.s32 1, %s468_s10  ;;  %p410_p0 = scmp.ge.s32.totalorder %s472_s11, 1  ;;  %s472_s11 = sphi %s494_s11, %s12_s11   ;;  %s468_s10 = sphi %s492_s10, %s570_s10   ;;  %s464_s9 = sphi %s490_s9, %s569_s9  }
   0x3   : > { %p26_p1 = scmp.ge.s32.totalorder %s24_s12, 2  ;;  %p143_p2 = scmp.lt.s32.totalorder %s472_s11, 3 }
   0x5   : > { %s572_s12 = smov (%p26_p1, %s24_s12), 0  ;;  %p144_p3 = pnand %p410_p0, %p143_p2 }
   0x6   : > { %p179_p4 = scmp.lt.s32.totalorder (!%p144_p3), %s464_s9, 1 }
   0x7   : > { %147 = sbr.rel (%p144_p3) target bundleno = 155 (0x9b), region = 28 }
   0xc   : > { %v474_v0 = vmov 0   ;;  %s574_s9 = smov (!%p179_p4, %s464_s9), 1 }
   0xd   : > { %448 = vset.pattern.permute.xlu1 %v474_v0  ;;  %447 = vset.pattern.permute.xlu0 %v474_v0  ;;  %s420_s13 = sshll.u32 %s574_s9, 6  ;;  %s419_s17 = sshll.u32 %s574_s9, 7 }
   0xe   : > { %449 = vset.pattern.permute.xlu2 %v474_v0  ;;  %s192_s16 = scalar_lea.vmem %s567_s1, %s420_s13  ;;  %s518_s20 = scalar_lea.vmem %s566_s0, %s419_s17 }
   0xf   : > { %v221_v1 = vld [vmem:[%s192_s16 + $0x10] sm:$0xff]  ;;  %v219_v2 = vld [vmem:[%s192_s16] sm:$0xff]  ;;  %v222_v7 = vld [vmem:[%s192_s16 + $0x18] sm:$0xff]  ;;  %s525_s23 = scalar_lea.vmem %s568_s2, %s419_s17 }
  0x10   : > { %v229_v3 = vadd.f32 1.0, %v221_v1  ;;  %v227_v4 = vadd.f32 1.0, %v219_v2  ;;  %v223_v5 = vld [vmem:[%s192_s16 + $0x20] sm:$0xff]  ;;  %v220_v8 = vld [vmem:[%s192_s16 + $0x8] sm:$0xff]  ;;  %v230_v10 = vadd.f32 1.0, %v222_v7  ;;  %v226_v13 = vld [vmem:[%s192_s16 + $0x38] sm:$0xff] }
  0x11   : > { %v231_v6 = vadd.f32 1.0, %v223_v5  ;;  %v224_v9 = vld [vmem:[%s192_s16 + $0x28] sm:$0xff]  ;;  %v228_v11 = vadd.f32 1.0, %v220_v8  ;;  %v225_v14 = vld [vmem:[%s192_s16 + $0x30] sm:$0xff]  ;;  %v234_v15 = vadd.f32 1.0, %v226_v13  ;;  %v211_v17 = vld [vmem:[%s518_s20 + $0x40] sm:$0xff] }
  0x12   : > { %247 = vperm.xlu1 %448, %v229_v3   ;;  %237 = vperm.xlu0 %447, %v227_v4   ;;  %v232_v12 = vadd.f32 1.0, %v224_v9  ;;  %v233_v16 = vadd.f32 1.0, %v225_v14  ;;  %v212_v18 = vld [vmem:[%s518_s20 + $0x48] sm:$0xff]  ;;  %v213_v22 = vld [vmem:[%s518_s20 + $0x50] sm:$0xff]  ;;  %v214_v23 = vld [vmem:[%s518_s20 + $0x58] sm:$0xff] }
  0x13   : > { %257 = vperm.xlu2 %449, %v231_v6   ;;  %v207_v27 = vld [vmem:[%s518_s20 + $0x20] sm:$0xff]  ;;  %v208_v28 = vld [vmem:[%s518_s20 + $0x28] sm:$0xff]  ;;  %v209_v37 = vld [vmem:[%s518_s20 + $0x30] sm:$0xff] }
  0x14   : > { %v203_v29 = vld [vmem:[%s518_s20] sm:$0xff]  ;;  %v204_v30 = vld [vmem:[%s518_s20 + $0x8] sm:$0xff]  ;;  %v210_v38 = vld [vmem:[%s518_s20 + $0x38] sm:$0xff] }
  0x15   : > { %v205_v39 = vld [vmem:[%s518_s20 + $0x10] sm:$0xff]  ;;  %v206_v40 = vld [vmem:[%s518_s20 + $0x18] sm:$0xff]  ;;  %v215_v49 = vld [vmem:[%s518_s20 + $0x60] sm:$0xff] }
  0x16   : > { %v217_v47 = vld [vmem:[%s518_s20 + $0x70] sm:$0xff]  ;;  %v218_v48 = vld [vmem:[%s518_s20 + $0x78] sm:$0xff]  ;;  %v216_v50 = vld [vmem:[%s518_s20 + $0x68] sm:$0xff] }
  0x1a   : > { %252 = vperm.xlu1 %448, %v230_v10   ;;  %242 = vperm.xlu0 %447, %v228_v11  }
  0x1b   : > { %262 = vperm.xlu2 %449, %v232_v12  }
  0x22   : > { %272 = vperm.xlu1 %448, %v234_v15   ;;  %267 = vperm.xlu0 %447, %v233_v16  }
  0x6d   : > { %v258_v19 = vpop.permute.xlu2 %257 }
  0x6e   : > { %v283_v20 = vmul.f32 %v258_v19, %v211_v17  ;;  %v284_v21 = vmul.f32 %v258_v19, %v212_v18 }
  0x70   : > { %299 = vst [vmem:[%s525_s23 + $0x40] sm:$0xff] %v283_v20 }
  0x71   : > { %300 = vst [vmem:[%s525_s23 + $0x48] sm:$0xff] %v284_v21 }
  0x75   : > { %v263_v24 = vpop.permute.xlu2 %262 }
  0x76   : > { %v285_v25 = vmul.f32 %v263_v24, %v213_v22  ;;  %v286_v26 = vmul.f32 %v263_v24, %v214_v23 }
  0x78   : > { %301 = vst [vmem:[%s525_s23 + $0x50] sm:$0xff] %v285_v25 }
  0x79   : > { %302 = vst [vmem:[%s525_s23 + $0x58] sm:$0xff] %v286_v26 }
  0x84   : > { %v248_v31 = vpop.permute.xlu1 %247  ;;  %v238_v32 = vpop.permute.xlu0 %237 }
  0x85   : > { %v279_v33 = vmul.f32 %v248_v31, %v207_v27  ;;  %v280_v34 = vmul.f32 %v248_v31, %v208_v28  ;;  %v275_v35 = vmul.f32 %v238_v32, %v203_v29  ;;  %v276_v36 = vmul.f32 %v238_v32, %v204_v30 }
  0x87   : > { %295 = vst [vmem:[%s525_s23 + $0x20] sm:$0xff] %v279_v33 }
  0x88   : > { %296 = vst [vmem:[%s525_s23 + $0x28] sm:$0xff] %v280_v34 }
  0x89   : > { %291 = vst [vmem:[%s525_s23] sm:$0xff] %v275_v35 }
  0x8a   : > { %292 = vst [vmem:[%s525_s23 + $0x8] sm:$0xff] %v276_v36 }
  0x8c   : > { %v253_v41 = vpop.permute.xlu1 %252  ;;  %v243_v42 = vpop.permute.xlu0 %242 }
  0x8d   : > { %v281_v43 = vmul.f32 %v253_v41, %v209_v37  ;;  %v282_v44 = vmul.f32 %v253_v41, %v210_v38  ;;  %v277_v45 = vmul.f32 %v243_v42, %v205_v39  ;;  %v278_v46 = vmul.f32 %v243_v42, %v206_v40 }
  0x8f   : > { %297 = vst [vmem:[%s525_s23 + $0x30] sm:$0xff] %v281_v43 }
  0x90   : > { %298 = vst [vmem:[%s525_s23 + $0x38] sm:$0xff] %v282_v44 }
  0x91   : > { %293 = vst [vmem:[%s525_s23 + $0x10] sm:$0xff] %v277_v45 }
  0x92   : > { %294 = vst [vmem:[%s525_s23 + $0x18] sm:$0xff] %v278_v46 }
  0x94   : > { %v273_v51 = vpop.permute.xlu1 %272  ;;  %v268_v52 = vpop.permute.xlu0 %267 }
  0x95   : > { %v289_v53 = vmul.f32 %v273_v51, %v217_v47  ;;  %v290_v54 = vmul.f32 %v273_v51, %v218_v48  ;;  %v287_v55 = vmul.f32 %v268_v52, %v215_v49  ;;  %v288_v56 = vmul.f32 %v268_v52, %v216_v50 }
  0x97   : > { %305 = vst [vmem:[%s525_s23 + $0x70] sm:$0xff] %v289_v53 }
  0x98   : > { %306 = vst [vmem:[%s525_s23 + $0x78] sm:$0xff] %v290_v54 }
  0x99   : > { %303 = vst [vmem:[%s525_s23 + $0x60] sm:$0xff] %v287_v55 }
  0x9a   : > { %304 = vst [vmem:[%s525_s23 + $0x68] sm:$0xff] %v288_v56 }
  0x9b PF: > { %s12_s11 = sadd.s32 1, %s472_s11   ;;  %s569_s9 = smov %s468_s10 }
  0x9c   : > { %p9_p5 = scmp.ge.s32.totalorder %s12_s11, 4   ;;  %s570_s10 = smov %s572_s12 }
  0x9e   :  { %11 = sbr.rel (!%p9_p5) target bundleno = 2 (0x2), region = 61 }

// kernel: channel_atten_forward.2
= control target key start
LH: loop header
LB: loop body
LE: loop exit
PB: predicated region body
PF: predicated region fallthrough
CT: control target
= control target key end

     0   :  { %s810_s15 = smov 0   ;;  %s812_s16 = smov 0   ;;  %s1035_s0 = inlined_call_operand.vmem [shape: f32[2,64,256], index: 0, kind: input, shape index: {}]   ;;  %s1036_s1 = inlined_call_operand.vmem [shape: f32[64,64], index: 1, kind: input, shape index: {}]   ;;  %s1037_s2 = inlined_call_operand.vmem [shape: f32[64,1], index: 2, kind: input, shape index: {}]   ;;  %s1038_s3 = inlined_call_operand.vmem [shape: f32[64,1], index: 3, kind: input, shape index: {}]   ;;  %s1039_s4 = inlined_call_operand.vmem [shape: f32[2,64,1], index: 4, kind: output, shape index: {}]  }
   0x1   :  { %s814_s17 = smov 0  }
   0x2 LB: > { %s26_s18 = sadd.s32 1, %s778_s16  ;;  %p662_p0 = scmp.ge.s32.totalorder %s782_s17, 1  ;;  %s782_s17 = sphi %s814_s17, %s14_s17   ;;  %s778_s16 = sphi %s812_s16, %s1045_s16   ;;  %s774_s15 = sphi %s810_s15, %s1044_s15  }
   0x3   : > { %p28_p1 = scmp.ge.s32.totalorder %s26_s18, 2  ;;  %p181_p2 = scmp.lt.s32.totalorder %s782_s17, 3 }
   0x5   : > { %s1047_s18 = smov (%p28_p1, %s26_s18), 0  ;;  %p182_p3 = pnand %p662_p0, %p181_p2 }
   0x6   : > { %p212_p4 = scmp.lt.s32.totalorder (!%p182_p3), %s774_s15, 1 }
   0x7   : > { %185 = sbr.rel (%p182_p3) target bundleno = 351 (0x15f), region = 36 }
   0xc   : > { %vm230_vm0 = vcmask 7168   ;;  %v784_v0 = vmov 0.0   ;;  %s1049_s15 = smov (!%p212_p4, %s774_s15), 1  ;;  %vm331_vm1 = vcmask 523264  }
   0xd   : > { %238 = vst.msk [vmem:[#allocation2 + $0x38] sm:$0xff] %vm230_vm0, %v784_v0  ;;  %s677_s19 = sshll.u32 %s1049_s15, 7  ;;  %s678_s27 = sshll.u32 %s1049_s15, 6 }
   0xe   : > { %231 = vst.msk [vmem:[#allocation2] sm:$0xff] %vm230_vm0, %v784_v0  ;;  %s838_s22 = scalar_lea.vmem %s1035_s0, %s677_s19  ;;  %s963_s15 = scalar_lea.vmem %s1039_s4, %s678_s27 }
   0xf   : > { %232 = vst.msk [vmem:[#allocation2 + $0x8] sm:$0xff] %vm230_vm0, %v784_v0  ;;  %v261_v1 = vld [vmem:[%s838_s22 + $0x70] sm:$0xff]  ;;  %v262_v2 = vld [vmem:[%s838_s22 + $0x78] sm:$0xff]  ;;  %v259_v10 = vld [vmem:[%s838_s22 + $0x60] sm:$0xff] }
  0x10   : > { %233 = vst.msk [vmem:[#allocation2 + $0x10] sm:$0xff] %vm230_vm0, %v784_v0  ;;  %v257_v3 = vld [vmem:[%s838_s22 + $0x50] sm:$0xff]  ;;  %v284_v4 = vadd.f32 %v262_v2, %v261_v1  ;;  %v258_v5 = vld [vmem:[%s838_s22 + $0x58] sm:$0xff]  ;;  %v260_v11 = vld [vmem:[%s838_s22 + $0x68] sm:$0xff] }
  0x11   : > { %234 = vst.msk [vmem:[#allocation2 + $0x18] sm:$0xff] %vm230_vm0, %v784_v0  ;;  %v278_v6 = vadd.f32 %v258_v5, %v257_v3  ;;  %v253_v7 = vld [vmem:[%s838_s22 + $0x30] sm:$0xff]  ;;  %v254_v8 = vld [vmem:[%s838_s22 + $0x38] sm:$0xff]  ;;  %v255_v12 = vld [vmem:[%s838_s22 + $0x40] sm:$0xff]  ;;  %v281_v16 = vadd.f32 %v260_v11, %v259_v10 }
  0x12   : > { %235 = vst.msk [vmem:[#allocation2 + $0x20] sm:$0xff] %vm230_vm0, %v784_v0  ;;  %285 = vadd.xlane.f32.xlu0 %v284_v4  ;;  %v272_v9 = vadd.f32 %v254_v8, %v253_v7  ;;  %v256_v13 = vld [vmem:[%s838_s22 + $0x48] sm:$0xff]  ;;  %v251_v14 = vld [vmem:[%s838_s22 + $0x20] sm:$0xff]  ;;  %v249_v19 = vld [vmem:[%s838_s22 + $0x10] sm:$0xff] }
  0x13   : > { %236 = vst.msk [vmem:[#allocation2 + $0x28] sm:$0xff] %vm230_vm0, %v784_v0  ;;  %279 = vadd.xlane.f32.xlu1 %v278_v6  ;;  %v252_v15 = vld [vmem:[%s838_s22 + $0x28] sm:$0xff]  ;;  %v275_v17 = vadd.f32 %v256_v13, %v255_v12  ;;  %v250_v20 = vld [vmem:[%s838_s22 + $0x18] sm:$0xff]  ;;  %v247_v21 = vld [vmem:[%s838_s22] sm:$0xff] }
  0x14   : > { %237 = vst.msk [vmem:[#allocation2 + $0x30] sm:$0xff] %vm230_vm0, %v784_v0  ;;  %273 = vadd.xlane.f32.xlu2 %v272_v9  ;;  %v269_v18 = vadd.f32 %v252_v15, %v251_v14  ;;  %v248_v22 = vld [vmem:[%s838_s22 + $0x8] sm:$0xff]  ;;  %v266_v23 = vadd.f32 %v250_v20, %v249_v19  ;;  %v246_v25 = vld [vmem:[#allocation2 + $0x38] sm:$0xff]  ;;  %v323_v1 = vld [vmem:[%s1036_s1] sm:$0xff] }
  0x15   : > { %v263_v24 = vadd.f32 %v248_v22, %v247_v21  ;;  %v239_v46 = vld [vmem:[#allocation2] sm:$0xff]  ;;  %v325_v2 = vld [vmem:[%s1036_s1 + $0x10] sm:$0xff]  ;;  %v324_v5 = vld [vmem:[%s1036_s1 + $0x8] sm:$0xff] }
  0x16   : > { %v240_v45 = vld [vmem:[#allocation2 + $0x8] sm:$0xff]  ;;  %v327_v3 = vld [vmem:[%s1036_s1 + $0x20] sm:$0xff]  ;;  %v329_v4 = vld [vmem:[%s1036_s1 + $0x30] sm:$0xff] }
  0x17   : > { %v241_v37 = vld [vmem:[#allocation2 + $0x10] sm:$0xff]  ;;  %v326_v6 = vld [vmem:[%s1036_s1 + $0x18] sm:$0xff]  ;;  %v328_v7 = vld [vmem:[%s1036_s1 + $0x28] sm:$0xff] }
  0x18   : > { %v242_v28 = vld [vmem:[#allocation2 + $0x18] sm:$0xff]  ;;  %v397_v9 = vld [vmem:[%s1037_s2] sm:$0xff]  ;;  %v399_v10 = vld [vmem:[%s1037_s2 + $0x10] sm:$0xff] }
  0x19   : > { %v243_v35 = vld [vmem:[#allocation2 + $0x20] sm:$0xff]  ;;  %v330_v8 = vld [vmem:[%s1036_s1 + $0x38] sm:$0xff]  ;;  %v415_v14 = vld [vmem:[%s1038_s3 + $0x10] sm:$0xff] }
  0x1a   : > { %282 = vadd.xlane.f32.xlu0 %v281_v16  ;;  %v244_v26 = vld [vmem:[#allocation2 + $0x28] sm:$0xff]  ;;  %v413_v12 = vld [vmem:[%s1038_s3] sm:$0xff]  ;;  %v403_v22 = vld [vmem:[%s1037_s2 + $0x30] sm:$0xff] }
  0x1b   : > { %276 = vadd.xlane.f32.xlu1 %v275_v17  ;;  %v245_v34 = vld [vmem:[#allocation2 + $0x30] sm:$0xff]  ;;  %v401_v21 = vld [vmem:[%s1037_s2 + $0x20] sm:$0xff] }
  0x1c   : > { %270 = vadd.xlane.f32.xlu2 %v269_v18 }
  0x22   : > { %267 = vadd.xlane.f32.xlu0 %v266_v23  ;;  %v398_v23 = vld [vmem:[%s1037_s2 + $0x8] sm:$0xff] }
  0x23   : > { %264 = vadd.xlane.f32.xlu1 %v263_v24  ;;  %v400_v24 = vld [vmem:[%s1037_s2 + $0x18] sm:$0xff] }
  0x85   : > { %v286_v27 = vpop.xlane.xlu0 %285 }
  0x86   : > { %v294_v29 = vadd.f32 %v286_v27, %v246_v25  ;;  %v280_v30 = vpop.xlane.xlu1 %279 }
  0x87   : > { %v292_v31 = vadd.f32 %v280_v30, %v244_v26  ;;  %v274_v32 = vpop.xlane.xlu2 %273  ;;  %v419_v30 = vld [vmem:[%s1038_s3 + $0x30] sm:$0xff] }
  0x88   : > { %303 = vst.msk [vmem:[#allocation2 + $0x38] sm:$0xff] %vm230_vm0, %v294_v29  ;;  %v290_v33 = vadd.f32 %v274_v32, %v242_v28  ;;  %v417_v28 = vld [vmem:[%s1038_s3 + $0x20] sm:$0xff] }
  0x89   : > { %301 = vst.msk [vmem:[#allocation2 + $0x28] sm:$0xff] %vm230_vm0, %v292_v31 }
  0x8a   : > { %299 = vst.msk [vmem:[#allocation2 + $0x18] sm:$0xff] %vm230_vm0, %v290_v33 }
  0x8d   : > { %v283_v36 = vpop.xlane.xlu0 %282 }
  0x8e   : > { %v293_v38 = vadd.f32 %v283_v36, %v245_v34  ;;  %v277_v39 = vpop.xlane.xlu1 %276  ;;  %v414_v34 = vld [vmem:[%s1038_s3 + $0x8] sm:$0xff]  ;;  %v416_v36 = vld [vmem:[%s1038_s3 + $0x18] sm:$0xff] }
  0x8f   : > { %v291_v40 = vadd.f32 %v277_v39, %v243_v35  ;;  %v314_v41 = vld [vmem:[#allocation2 + $0x38] sm:$0xff]  ;;  %v271_v42 = vpop.xlane.xlu2 %270 }
  0x90   : > { %302 = vst.msk [vmem:[#allocation2 + $0x30] sm:$0xff] %vm230_vm0, %v293_v38  ;;  %v322_v43 = vmul.f32 0.00390625, %v314_v41  ;;  %v289_v44 = vadd.f32 %v271_v42, %v241_v37  ;;  %v312_v52 = vld [vmem:[#allocation2 + $0x28] sm:$0xff] }
  0x91   : > { %300 = vst.msk [vmem:[#allocation2 + $0x20] sm:$0xff] %vm230_vm0, %v291_v40  ;;  %v320_v55 = vmul.f32 0.00390625, %v312_v52  ;;  %v310_v57 = vld [vmem:[#allocation2 + $0x18] sm:$0xff] }
  0x92   : > { %364 = vmatpush.msra.mxu0 %v322_v43  ;;  %679 = vmatpush.msra.mxu1 %v322_v43  ;;  %298 = vst.msk [vmem:[#allocation2 + $0x10] sm:$0xff] %vm230_vm0, %v289_v44  ;;  %v318_v59 = vmul.f32 0.00390625, %v310_v57 }
  0x93   : > { %680 = vmatpush.msra.mxu2 %v322_v43  ;;  %681 = vmatpush.msra.mxu3 %v322_v43 }
  0x95   : > { %v268_v47 = vpop.xlane.xlu0 %267 }
  0x96   : > { %v288_v48 = vadd.f32 %v268_v47, %v240_v45  ;;  %v265_v49 = vpop.xlane.xlu1 %264  ;;  %v402_v47 = vld [vmem:[%s1037_s2 + $0x28] sm:$0xff] }
  0x97   : > { %v287_v50 = vadd.f32 %v265_v49, %v239_v46  ;;  %v313_v51 = vld [vmem:[#allocation2 + $0x30] sm:$0xff] }
  0x98   : > { %297 = vst.msk [vmem:[#allocation2 + $0x8] sm:$0xff] %vm230_vm0, %v288_v48  ;;  %v321_v53 = vmul.f32 0.00390625, %v313_v51  ;;  %v311_v54 = vld [vmem:[#allocation2 + $0x20] sm:$0xff] }
  0x99   : > { %296 = vst.msk [vmem:[#allocation2] sm:$0xff] %vm230_vm0, %v287_v50  ;;  %v319_v56 = vmul.f32 0.00390625, %v311_v54  ;;  %v309_v58 = vld [vmem:[#allocation2 + $0x10] sm:$0xff] }
  0x9a   : > { %365 = vmatpush.msra.mxu0 %v321_v53  ;;  %682 = vmatpush.msra.mxu1 %v321_v53  ;;  %v317_v60 = vmul.f32 0.00390625, %v309_v58  ;;  %v418_v58 = vld [vmem:[%s1038_s3 + $0x28] sm:$0xff] }
  0x9b   : > { %683 = vmatpush.msra.mxu2 %v321_v53  ;;  %684 = vmatpush.msra.mxu3 %v321_v53 }
  0x9c   : > { %366 = vmatpush.msra.mxu0 %v320_v55  ;;  %685 = vmatpush.msra.mxu1 %v320_v55 }
  0x9d   : > { %686 = vmatpush.msra.mxu2 %v320_v55  ;;  %687 = vmatpush.msra.mxu3 %v320_v55 }
  0x9e   : > { %367 = vmatpush.msra.mxu0 %v319_v56  ;;  %688 = vmatpush.msra.mxu1 %v319_v56 }
  0x9f   : > { %689 = vmatpush.msra.mxu2 %v319_v56  ;;  %690 = vmatpush.msra.mxu3 %v319_v56  ;;  %v308_v61 = vld [vmem:[#allocation2 + $0x8] sm:$0xff] }
  0xa0   : > { %368 = vmatpush.msra.mxu0 %v318_v59  ;;  %691 = vmatpush.msra.mxu1 %v318_v59  ;;  %v316_v62 = vmul.f32 0.00390625, %v308_v61  ;;  %v307_v63 = vld [vmem:[#allocation2] sm:$0xff] }
  0xa1   : > { %692 = vmatpush.msra.mxu2 %v318_v59  ;;  %693 = vmatpush.msra.mxu3 %v318_v59  ;;  %v315_v0 = vmul.f32 0.00390625, %v307_v63  ;;  %v420_v63 = vld [vmem:[%s1038_s3 + $0x38] sm:$0xff] }
  0xa2   : > { %369 = vmatpush.msra.mxu0 %v317_v60  ;;  %694 = vmatpush.msra.mxu1 %v317_v60 }
  0xa3   : > { %695 = vmatpush.msra.mxu2 %v317_v60  ;;  %696 = vmatpush.msra.mxu3 %v317_v60  ;;  %v404_v60 = vld [vmem:[%s1037_s2 + $0x38] sm:$0xff] }
  0xa4   : > { %370 = vmatpush.msra.mxu0 %v316_v62  ;;  %697 = vmatpush.msra.mxu1 %v316_v62 }
  0xa5   : > { %698 = vmatpush.msra.mxu2 %v316_v62  ;;  %699 = vmatpush.msra.mxu3 %v316_v62 }
  0xa6   : > { %371 = vmatpush.msra.mxu0 %v315_v0  ;;  %700 = vmatpush.msra.mxu1 %v315_v0 }
  0xa7   : > { %701 = vmatpush.msra.mxu2 %v315_v0  ;;  %702 = vmatpush.msra.mxu3 %v315_v0 }
  0xa8   : > { %667 = vmatmul.msk.f32.vlgmr.msra.gmra.mxu0 %vm331_vm1, %v323_v1  ;;  %669 = vmatmul.msk.f32.vlgmr.msra.gmra.mxu1 %vm331_vm1, %v325_v2 }
  0xa9   : > { %671 = vmatmul.msk.f32.vlgmr.msra.gmra.mxu2 %vm331_vm1, %v327_v3  ;;  %673 = vmatmul.msk.f32.vlgmr.msra.gmra.mxu3 %vm331_vm1, %v329_v4 }
  0xb0   : > { %668 = vmatmul.msk.f32.gmra.mxu0 %vm331_vm1, %v324_v5  ;;  %670 = vmatmul.msk.f32.gmra.mxu1 %vm331_vm1, %v326_v6 }
  0xb1   : > { %672 = vmatmul.msk.f32.gmra.mxu2 %vm331_vm1, %v328_v7  ;;  %674 = vmatmul.msk.f32.gmra.mxu3 %vm331_vm1, %v330_v8 }
 0x125   : > { %v373_v11 = vpop.f32.mrf.mxu0  ;;  %v379_v13 = vpop.f32.mrf.mxu1 }
 0x126   : > { %v405_v15 = vmul.f32 %v397_v9, %v373_v11  ;;  %v407_v16 = vmul.f32 %v399_v10, %v379_v13 }
 0x128   : > { %v421_v17 = vadd.f32 %v413_v12, %v405_v15  ;;  %v423_v18 = vadd.f32 %v415_v14, %v407_v16 }
 0x12a   : > { %v429_v19 = vsub.f32 0.0, %v421_v17  ;;  %v431_v20 = vsub.f32 0.0, %v423_v18 }
 0x12c   : > { %v437_v25 = vmul.f32 1.442695, %v429_v19  ;;  %v441_v26 = vmul.f32 1.442695, %v431_v20  ;;  %v385_v27 = vpop.f32.mrf.mxu2  ;;  %v391_v29 = vpop.f32.mrf.mxu3 }
 0x12d   : > { %v409_v31 = vmul.f32 %v401_v21, %v385_v27  ;;  %v411_v32 = vmul.f32 %v403_v22, %v391_v29  ;;  %v376_v33 = vpop.f32.mrf.mxu0  ;;  %v382_v35 = vpop.f32.mrf.mxu1 }
 0x12e   : > { %728 = vpow2.f32 %v437_v25  ;;  %v406_v37 = vmul.f32 %v398_v23, %v376_v33  ;;  %v408_v38 = vmul.f32 %v400_v24, %v382_v35 }
 0x12f   : > { %730 = vpow2.f32 %v441_v26  ;;  %v425_v39 = vadd.f32 %v417_v28, %v409_v31  ;;  %v427_v40 = vadd.f32 %v419_v30, %v411_v32 }
 0x130   : > { %v422_v41 = vadd.f32 %v414_v34, %v406_v37  ;;  %v424_v42 = vadd.f32 %v416_v36, %v408_v38 }
 0x131   : > { %v433_v43 = vsub.f32 0.0, %v425_v39  ;;  %v435_v44 = vsub.f32 0.0, %v427_v40 }
 0x132   : > { %v430_v45 = vsub.f32 0.0, %v422_v41  ;;  %v432_v46 = vsub.f32 0.0, %v424_v42 }
 0x133   : > { %v445_v48 = vmul.f32 1.442695, %v433_v43  ;;  %v449_v49 = vmul.f32 1.442695, %v435_v44 }
 0x134   : > { %v729_v50 = vpop.eup %728  ;;  %v388_v51 = vpop.f32.mrf.mxu2  ;;  %v439_v54 = vmul.f32 1.442695, %v430_v45  ;;  %v443_v57 = vmul.f32 1.442695, %v432_v46 }
 0x135   : > { %v731_v52 = vpop.eup %730  ;;  %v453_v53 = vadd.f32 1.0, %v729_v50  ;;  %732 = vpow2.f32 %v445_v48  ;;  %v410_v55 = vmul.f32 %v402_v47, %v388_v51  ;;  %v394_v59 = vpop.f32.mrf.mxu3 }
 0x136   : > { %v455_v56 = vadd.f32 1.0, %v731_v52  ;;  %734 = vpow2.f32 %v449_v49  ;;  %v412_v62 = vmul.f32 %v404_v60, %v394_v59 }
 0x137   : > { %736 = vrcp.f32 %v453_v53  ;;  %v426_v61 = vadd.f32 %v418_v58, %v410_v55  ;;  %vm466_vm2 = vweird.f32 %v453_v53  ;;  %v470_v14 = vand.u32 2147483647, %v453_v53 }
 0x138   : > { %738 = vrcp.f32 %v455_v56  ;;  %v428_v6 = vadd.f32 %v420_v63, %v412_v62  ;;  %v472_v15 = vand.u32 2147483648, %v453_v53  ;;  %v500_v17 = vand.u32 2147483647, %v455_v56 }
 0x139   : > { %740 = vpow2.f32 %v439_v54  ;;  %v434_v1 = vsub.f32 0.0, %v426_v61  ;;  %v502_v18 = vand.u32 2147483648, %v455_v56  ;;  %vm496_vm4 = vweird.f32 %v455_v56 }
 0x13a   : > { %742 = vpow2.f32 %v443_v57  ;;  %v436_v19 = vsub.f32 0.0, %v428_v6  ;;  %vm471_vm6 = vcmp.eq.f32.partialorder %v470_v14, 8.507059e+37  ;;  %v473_v26 = vor.u32 1.1754944e-38, %v472_v15 }
 0x13b   : > { %v733_v0 = vpop.eup %732  ;;  %v447_v11 = vmul.f32 1.442695, %v434_v1  ;;  %vm501_vm8 = vcmp.eq.f32.partialorder %v500_v17, 8.507059e+37  ;;  %v503_v32 = vor.u32 1.1754944e-38, %v502_v18 }
 0x13c   : > { %v735_v2 = vpop.eup %734  ;;  %v948_v3 = vadd.f32 1.0, %v733_v0  ;;  %v451_v29 = vmul.f32 1.442695, %v436_v19 }
 0x13d   : > { %v737_v4 = vpop.eup %736  ;;  %v950_v5 = vadd.f32 1.0, %v735_v2 }
 0x13e   : > { %v739_v7 = vpop.eup %738  ;;  %v462_v8 = vmul.f32 %v737_v4, %v453_v53  ;;  %744 = vrcp.f32 %v948_v3  ;;  %vm467_vm3 = vweird.f32 %v737_v4  ;;  %v530_v33 = vand.u32 2147483647, %v948_v3 }
 0x13f   : > { %v741_v9 = vpop.eup %740  ;;  %v492_v10 = vmul.f32 %v739_v7, %v455_v56  ;;  %746 = vrcp.f32 %v950_v5  ;;  %vm497_vm5 = vweird.f32 %v739_v7  ;;  %vm468_vm7 = vmor %vm466_vm2, %vm467_vm3  ;;  %v532_v39 = vand.u32 2147483648, %v948_v3 }
 0x140   : > { %v743_v12 = vpop.eup %742  ;;  %v463_v13 = vsub.f32 1.0, %v462_v8  ;;  %v955_v21 = vadd.f32 1.0, %v741_v9  ;;  %748 = vpow2.f32 %v447_v11  ;;  %vm498_vm9 = vmor %vm496_vm4, %vm497_vm5  ;;  %v560_v40 = vand.u32 2147483647, %v950_v5 }
 0x141   : > { %v493_v16 = vsub.f32 1.0, %v492_v10  ;;  %v957_v22 = vadd.f32 1.0, %v743_v12  ;;  %v562_v41 = vand.u32 2147483648, %v950_v5  ;;  %vm526_vm11 = vweird.f32 %v948_v3 }
 0x142   : > { %v464_v20 = vmul.f32 %v737_v4, %v463_v13  ;;  %750 = vrcp.f32 %v955_v21  ;;  %vm980_vm12 = vcmp.eq.f32.partialorder %v530_v33, 8.507059e+37  ;;  %vm556_vm13 = vweird.f32 %v950_v5 }
 0x143   : > { %v494_v23 = vmul.f32 %v739_v7, %v493_v16  ;;  %752 = vrcp.f32 %v957_v22  ;;  %v533_v52 = vor.u32 1.1754944e-38, %v532_v39  ;;  %vm988_vm1 = vcmp.eq.f32.partialorder %v560_v40, 8.507059e+37 }
 0x144   : > { %v745_v24 = vpop.eup %744  ;;  %v465_v25 = vadd.f32 %v737_v4, %v464_v20  ;;  %754 = vpow2.f32 %v451_v29  ;;  %v563_v54 = vor.u32 1.1754944e-38, %v562_v41  ;;  %vm481_vm3 = vweird.f32 %v955_v21 }
 0x145   : > { %v495_v27 = vadd.f32 %v739_v7, %v494_v23  ;;  %v522_v28 = vmul.f32 %v745_v24, %v948_v3  ;;  %v747_v30 = vpop.eup %746  ;;  %vm527_vm10 = vweird.f32 %v745_v24  ;;  %v485_v60 = vand.u32 2147483647, %v955_v21 }
 0x146   : > { %v469_v31 = vsel %vm468_vm7, %v737_v4, %v465_v25  ;;  %v552_v37 = vmul.f32 %v747_v30, %v950_v5  ;;  %v749_v42 = vpop.eup %748  ;;  %vm557_vm14 = vweird.f32 %v747_v30  ;;  %vm528_vm15 = vmor %vm526_vm11, %vm527_vm10  ;;  %v487_v61 = vand.u32 2147483648, %v955_v21 }
 0x147   : > { %v474_v34 = vsel %vm471_vm6, %v473_v26, %v469_v31  ;;  %v499_v35 = vsel %vm498_vm9, %v739_v7, %v495_v27  ;;  %v523_v36 = vsub.f32 1.0, %v522_v28  ;;  %v985_v47 = vadd.f32 1.0, %v749_v42  ;;  %vm558_vm2 = vmor %vm556_vm13, %vm557_vm14 }
 0x148   : > { %581 = vst.msk [vmem:[%s963_s15] sm:$0xff] %vm230_vm0, %v474_v34  ;;  %v504_v38 = vsel %vm501_vm8, %v503_v32, %v499_v35  ;;  %v553_v44 = vsub.f32 1.0, %v552_v37  ;;  %v751_v45 = vpop.eup %750  ;;  %vm511_vm5 = vweird.f32 %v957_v22  ;;  %v517_v3 = vand.u32 2147483648, %v957_v22 }
 0x149   : > { %583 = vst.msk [vmem:[%s963_s15 + $0x10] sm:$0xff] %vm230_vm0, %v504_v38  ;;  %v524_v43 = vmul.f32 %v745_v24, %v523_v36  ;;  %v477_v50 = vmul.f32 %v751_v45, %v955_v21  ;;  %v753_v51 = vpop.eup %752  ;;  %756 = vrcp.f32 %v985_v47  ;;  %vm482_vm4 = vweird.f32 %v751_v45 }
 0x14a   : > { %v554_v49 = vmul.f32 %v747_v30, %v553_v44  ;;  %v507_v58 = vmul.f32 %v753_v51, %v957_v22  ;;  %v755_v62 = vpop.eup %754  ;;  %vm512_vm6 = vweird.f32 %v753_v51  ;;  %v515_v7 = vand.u32 2147483647, %v957_v22  ;;  %vm483_vm7 = vmor %vm481_vm3, %vm482_vm4 }
 0x14b   : > { %v525_v48 = vadd.f32 %v745_v24, %v524_v43  ;;  %v478_v57 = vsub.f32 1.0, %v477_v50  ;;  %v460_v4 = vadd.f32 1.0, %v755_v62  ;;  %v488_v9 = vor.u32 1.1754944e-38, %v487_v61  ;;  %vm513_vm9 = vmor %vm511_vm5, %vm512_vm6 }
 0x14c   : > { %v555_v56 = vadd.f32 %v747_v30, %v554_v49  ;;  %v508_v1 = vsub.f32 1.0, %v507_v58  ;;  %vm486_vm8 = vcmp.eq.f32.partialorder %v485_v60, 8.507059e+37  ;;  %v518_v14 = vor.u32 1.1754944e-38, %v517_v3 }
 0x14d   : > { %v529_v55 = vsel %vm528_vm15, %v745_v24, %v525_v48  ;;  %v479_v0 = vmul.f32 %v751_v45, %v478_v57  ;;  %758 = vrcp.f32 %v460_v4  ;;  %vm516_vm10 = vcmp.eq.f32.partialorder %v515_v7, 8.507059e+37 }
 0x14e   : > { %v534_v59 = vsel %vm980_vm12, %v533_v52, %v529_v55  ;;  %v559_v63 = vsel %vm558_vm2, %v747_v30, %v555_v56  ;;  %v509_v6 = vmul.f32 %v753_v51, %v508_v1  ;;  %v547_v18 = vand.u32 2147483648, %v985_v47 }
 0x14f   : > { %585 = vst.msk [vmem:[%s963_s15 + $0x20] sm:$0xff] %vm230_vm0, %v534_v59  ;;  %v564_v2 = vsel %vm988_vm1, %v563_v54, %v559_v63  ;;  %v480_v5 = vadd.f32 %v751_v45, %v479_v0  ;;  %v757_v8 = vpop.eup %756  ;;  %v545_v20 = vand.u32 2147483647, %v985_v47  ;;  %vm541_vm12 = vweird.f32 %v985_v47 }
 0x150   : > { %587 = vst.msk [vmem:[%s963_s15 + $0x30] sm:$0xff] %vm230_vm0, %v564_v2  ;;  %v510_v11 = vadd.f32 %v753_v51, %v509_v6  ;;  %v537_v12 = vmul.f32 %v757_v8, %v985_v47  ;;  %vm542_vm11 = vweird.f32 %v757_v8  ;;  %v548_v24 = vor.u32 1.1754944e-38, %v547_v18 }
 0x151   : > { %v484_v10 = vsel %vm483_vm7, %v751_v45, %v480_v5  ;;  %vm543_vm13 = vmor %vm541_vm12, %vm542_vm11  ;;  %vm546_vm14 = vcmp.eq.f32.partialorder %v545_v20, 8.507059e+37  ;;  %v577_v28 = vand.u32 2147483648, %v460_v4  ;;  %v575_v30 = vand.u32 2147483647, %v460_v4 }
 0x152   : > { %v489_v13 = vsel %vm486_vm8, %v488_v9, %v484_v10  ;;  %v514_v15 = vsel %vm513_vm9, %v753_v51, %v510_v11  ;;  %v538_v16 = vsub.f32 1.0, %v537_v12  ;;  %vm571_vm1 = vweird.f32 %v460_v4 }
 0x153   : > { %582 = vst.msk [vmem:[%s963_s15 + $0x8] sm:$0xff] %vm230_vm0, %v489_v13  ;;  %v519_v17 = vsel %vm516_vm10, %v518_v14, %v514_v15  ;;  %v759_v21 = vpop.eup %758  ;;  %v578_v32 = vor.u32 1.1754944e-38, %v577_v28  ;;  %vm576_vm3 = vcmp.eq.f32.partialorder %v575_v30, 8.507059e+37 }
 0x154   : > { %584 = vst.msk [vmem:[%s963_s15 + $0x18] sm:$0xff] %vm230_vm0, %v519_v17  ;;  %v539_v19 = vmul.f32 %v757_v8, %v538_v16  ;;  %v567_v22 = vmul.f32 %v759_v21, %v460_v4  ;;  %vm572_vm15 = vweird.f32 %v759_v21 }
 0x155   : > { %vm573_vm2 = vmor %vm571_vm1, %vm572_vm15 }
 0x156   : > { %v540_v23 = vadd.f32 %v757_v8, %v539_v19  ;;  %v568_v26 = vsub.f32 1.0, %v567_v22 }
 0x158   : > { %v544_v25 = vsel %vm543_vm13, %v757_v8, %v540_v23  ;;  %v569_v29 = vmul.f32 %v759_v21, %v568_v26 }
 0x159   : > { %v549_v27 = vsel %vm546_vm14, %v548_v24, %v544_v25 }
 0x15a   : > { %586 = vst.msk [vmem:[%s963_s15 + $0x28] sm:$0xff] %vm230_vm0, %v549_v27  ;;  %v570_v31 = vadd.f32 %v759_v21, %v569_v29 }
 0x15c   : > { %v574_v33 = vsel %vm573_vm2, %v759_v21, %v570_v31 }
 0x15d   : > { %v579_v34 = vsel %vm576_vm3, %v578_v32, %v574_v33 }
 0x15e   : > { %588 = vst.msk [vmem:[%s963_s15 + $0x38] sm:$0xff] %vm230_vm0, %v579_v34 }
 0x15f PF: > { %s14_s17 = sadd.s32 1, %s782_s17   ;;  %s1044_s15 = smov %s778_s16 }
 0x160   : > { %p11_p5 = scmp.ge.s32.totalorder %s14_s17, 4   ;;  %s1045_s16 = smov %s1047_s18 }
 0x162   :  { %13 = sbr.rel (!%p11_p5) target bundleno = 2 (0x2), region = 74 }

</bundles_post_ra>
